<compile_context>
chip_gen: v7x
topology: tpu7x:2x2x1
jax: 0.10.0
libtpu: 0.0.40
codegen_flags: <defaults>
</compile_context>

<pallas_src>
import numpy as np
import jax
import jax.numpy as jnp
from jax.experimental import pallas as pl
from jax.experimental.pallas import tpu as pltpu

EPS = 1e-8
LANE = 128
SUBLANE = 8


# ----------------------------------------------------------------------------
# Deterministic parameter construction (mirrors STFTLoss.__init__)
# ----------------------------------------------------------------------------
def hann_window_periodic(win_length: int) -> np.ndarray:
    n = np.arange(win_length)
    return (0.5 - 0.5 * np.cos(2.0 * np.pi * n / win_length)).astype(np.float32)


def _hz_to_mel(freqs):
    freqs = np.asarray(freqs, dtype=np.float64)
    f_sp = 200.0 / 3
    mels = freqs / f_sp
    min_log_hz = 1000.0
    min_log_mel = min_log_hz / f_sp
    logstep = np.log(6.4) / 27.0
    return np.where(freqs >= min_log_hz,
                    min_log_mel + np.log(np.maximum(freqs, 1e-10) / min_log_hz) / logstep,
                    mels)


def _mel_to_hz(mels):
    mels = np.asarray(mels, dtype=np.float64)
    f_sp = 200.0 / 3
    freqs = f_sp * mels
    min_log_hz = 1000.0
    min_log_mel = min_log_hz / f_sp
    logstep = np.log(6.4) / 27.0
    return np.where(mels >= min_log_mel,
                    min_log_hz * np.exp(logstep * (mels - min_log_mel)),
                    freqs)


def mel_filterbank(sr: int, n_fft: int, n_mels: int) -> np.ndarray:
    """Slaney-style mel filterbank (librosa.filters.mel defaults)."""
    n_freq = n_fft // 2 + 1
    fftfreqs = np.linspace(0.0, sr / 2.0, n_freq)
    mel_pts = np.linspace(_hz_to_mel(0.0), _hz_to_mel(sr / 2.0), n_mels + 2)
    hz_pts = _mel_to_hz(mel_pts)
    fdiff = np.diff(hz_pts)
    ramps = hz_pts[:, None] - fftfreqs[None, :]
    weights = np.zeros((n_mels, n_freq), dtype=np.float64)
    for i in range(n_mels):
        lower = -ramps[i] / fdiff[i]
        upper = ramps[i + 2] / fdiff[i + 1]
        weights[i] = np.maximum(0.0, np.minimum(lower, upper))
    enorm = 2.0 / (hz_pts[2:n_mels + 2] - hz_pts[:n_mels])
    weights *= enorm[:, None]
    return weights.astype(np.float32)


def compute_mask(n_bins: int, freq_weights_p: float, warmup_epochs: int,
                 current_epoch: int = 0) -> np.ndarray:
    """Mirrors STFTLoss.compute_mask at construction time (epoch 0)."""
    if freq_weights_p == 0:
        return np.ones((n_bins, 1), dtype=np.float32)
    # NOTE: the torch module hardcodes a length-128 mask here (usable only
    # when n_bins == 128); mirrored verbatim, only the p == 0 path is tested.
    mask = (np.arange(128, dtype=np.float64) + 1.0) ** freq_weights_p
    mask = mask / mask.sum() * n_bins
    alpha = 1.0 - current_epoch / warmup_epochs
    mask = alpha * np.ones_like(mask) + (1.0 - alpha) * mask
    return mask[:, None].astype(np.float32)


def dft_matrices(fft_size: int, win_length: int) -> tuple[np.ndarray, np.ndarray]:
    """Window-folded real-DFT matrices: (F, K) cos and (F, K) -sin."""
    n_freq = fft_size // 2 + 1
    win = hann_window_periodic(win_length)
    win_full = np.zeros(fft_size, dtype=np.float32)
    lp = (fft_size - win_length) // 2
    win_full[lp:lp + win_length] = win
    n = np.arange(fft_size)[:, None]
    k = np.arange(n_freq)[None, :]
    ang = 2.0 * np.pi * n * k / fft_size
    cos_mat = (win_full[:, None] * np.cos(ang)).astype(np.float32)
    sin_mat = (-win_full[:, None] * np.sin(ang)).astype(np.float32)
    return cos_mat, sin_mat


def _round_up(n: int, m: int) -> int:
    return ((n + m - 1) // m) * m


def pad_constants(cos_np, sin_np, fb_np, mask_np, fft_size, n_bins):
    """Lane-dense, zero-padded constants for the kernel.

    Returns:
      rhs       (F, 2*Kp) bf16 : fused [cos | sin], K padded to a lane multiple
      fbt       (Kp, Mp)  bf16 : fb^T with sqrt(mask) folded into mel columns
      sqrtw_row (1, Mp)   f32  : sqrt(mask) row (zeros in padded lanes)
    Padded K lanes give identical sqrt(EPS) magnitudes for both signals, and
    padded fbt rows/cols are zero, so padding contributes exactly zero loss.
    """
    n_freq = fft_size // 2 + 1
    kp = _round_up(n_freq, LANE)
    mp = _round_up(n_bins, LANE)

    rhs = np.zeros((fft_size, 2 * kp), dtype=np.float32)
    rhs[:, :n_freq] = cos_np
    rhs[:, kp:kp + n_freq] = sin_np

    assert mask_np.shape[0] == n_bins, (
        "mask length must equal n_bins (torch module only supports "
        "freq_weights_p != 0 when n_bins == 128)")
    sqrt_w = np.sqrt(mask_np[:, 0].astype(np.float64)).astype(np.float32)

    fbt = np.zeros((kp, mp), dtype=np.float32)
    fbt[:n_freq, :n_bins] = fb_np.T * sqrt_w[None, :]

    sqrtw_row = np.zeros((1, mp), dtype=np.float32)
    sqrtw_row[0, :n_bins] = sqrt_w

    return (jnp.asarray(rhs).astype(jnp.bfloat16),
            jnp.asarray(fbt).astype(jnp.bfloat16),
            jnp.asarray(sqrtw_row))


def _default_n_par() -> int:
    """2 only on 2-TensorCore chips (v7x-style); 1 on v5e / v6e."""
    try:
        kind = jax.devices()[0].device_kind.lower()
    except Exception:
        return 1
    return 2 if ("v7" in kind or "tpu7" in kind) else 1


# ----------------------------------------------------------------------------
# Plain-JAX glue: framing (torch.stft center=True, pad_mode='reflect')
# ----------------------------------------------------------------------------
def frame_signal(x: jnp.ndarray, fft_size: int, hop_size: int) -> jnp.ndarray:
    """x: (B, T) -> frames: (B * n_frames, fft_size)."""
    pad = fft_size // 2
    xp = jnp.pad(x, ((0, 0), (pad, pad)), mode="reflect")
    t_pad = xp.shape[1]
    n_frames = 1 + (t_pad - fft_size) // hop_size
    idx = jnp.arange(n_frames)[:, None] * hop_size + jnp.arange(fft_size)[None, :]
    frames = xp[:, idx]                      # (B, n_frames, fft_size)
    return frames.reshape(-1, fft_size)


# ----------------------------------------------------------------------------
# Pallas kernel
# ----------------------------------------------------------------------------
def stft_loss_kernel(fx_ref, fh_ref, rhs_ref, fbt_ref, sqrtw_ref,
                     sabs_ref, ssq_ref):
    j = pl.program_id(1)                     # reduction axis ("arbitrary")

    @pl.when(j == 0)
    def _():
        sabs_ref[...] = jnp.zeros_like(sabs_ref)
        ssq_ref[...] = jnp.zeros_like(ssq_ref)

    kp = rhs_ref.shape[1] // 2

    # Two MXU passes against the shared [cos | sin] RHS (f32 accumulate).
    spec_x = jnp.dot(fx_ref[...], rhs_ref[...], preferred_element_type=jnp.float32)
    spec_h = jnp.dot(fh_ref[...], rhs_ref[...], preferred_element_type=jnp.float32)

    re_x, im_x = spec_x[:, :kp], spec_x[:, kp:]
    re_h, im_h = spec_h[:, :kp], spec_h[:, kp:]
    mag_x = jnp.sqrt(jnp.maximum(re_x * re_x + im_x * im_x, EPS))   # (T, Kp) f32
    mag_h = jnp.sqrt(jnp.maximum(re_h * re_h + im_h * im_h, EPS))

    # Subtract magnitudes in f32 BEFORE the (linear) mel projection, then one
    # bf16 matmul.  sqrt(mask) is pre-folded into fbt columns host-side.
    dmag = (mag_x - mag_h).astype(jnp.bfloat16)                     # (T, Kp)
    mel_d = jnp.dot(dmag, fbt_ref[...], preferred_element_type=jnp.float32)  # (T, Mp)

    dabs = jnp.abs(mel_d) * sqrtw_ref[...]   # |diff| * mask      (sqrt(w)*sqrt(w))
    dsq = mel_d * mel_d                      # diff^2 * mask      (already folded)

    # Pure-VPU partial sums into the resident output accumulator blocks;
    # the cross-sublane / cross-lane reduction is deferred to the wrapper.
    mp = mel_d.shape[-1]
    sabs_ref[...] += jnp.sum(dabs.reshape(-1, SUBLANE, mp), axis=0, keepdims=True)
    ssq_ref[...] += jnp.sum(dsq.reshape(-1, SUBLANE, mp), axis=0, keepdims=True)


def stft_loss_pallas(x, x_hat, rhs, fbt, sqrtw_row, n_bins,
                     fft_size, hop_size, tile_n=1024, n_par=None):
    if n_par is None:
        n_par = _default_n_par()

    # Flatten to (-1, T) as in the torch module.
    x2 = x.reshape(-1, x.shape[-1])
    xh2 = x_hat.reshape(-1, x_hat.shape[-1])

    # Frame and cast to bf16 immediately (halves the frame-matrix HBM bytes).
    fx = frame_signal(x2, fft_size, hop_size).astype(jnp.bfloat16)   # (N, F)
    fh = frame_signal(xh2, fft_size, hop_size).astype(jnp.bfloat16)  # (N, F)
    n_true, fdim = fx.shape

    # Large tiles amortize per-step pipeline overhead; clamp so tiny inputs
    # don't pad to a full 1024-frame tile.
    tile_n = max(SUBLANE, min(tile_n, _round_up(-(-n_true // n_par), SUBLANE)))
    assert tile_n % SUBLANE == 0

    # Pad frame count to n_par * nj * tile_n.  Zero frames give identical
    # magnitudes (sqrt(EPS)) for x and x_hat -> zero loss contribution.
    n_tiles = _round_up(max(1, -(-n_true // tile_n)), n_par)
    nj = n_tiles // n_par
    n_pad = n_tiles * tile_n
    fx = jnp.pad(fx, ((0, n_pad - n_true), (0, 0)))
    fh = jnp.pad(fh, ((0, n_pad - n_true), (0, 0)))

    mp = fbt.shape[1]

    sabs, ssq = pl.pallas_call(
        stft_loss_kernel,
        out_shape=(jax.ShapeDtypeStruct((n_par, SUBLANE, mp), jnp.float32),
                   jax.ShapeDtypeStruct((n_par, SUBLANE, mp), jnp.float32)),
        grid_spec=pltpu.PrefetchScalarGridSpec(
            num_scalar_prefetch=0,
            grid=(n_par, nj),
            in_specs=[
                pl.BlockSpec((tile_n, fdim), lambda p, j: (p * nj + j, 0)),
                pl.BlockSpec((tile_n, fdim), lambda p, j: (p * nj + j, 0)),
                pl.BlockSpec(rhs.shape, lambda p, j: (0, 0)),
                pl.BlockSpec(fbt.shape, lambda p, j: (0, 0)),
                pl.BlockSpec(sqrtw_row.shape, lambda p, j: (0, 0)),
            ],
            out_specs=(pl.BlockSpec((1, SUBLANE, mp), lambda p, j: (p, 0, 0)),
                       pl.BlockSpec((1, SUBLANE, mp), lambda p, j: (p, 0, 0))),
        ),
        compiler_params=pltpu.CompilerParams(
            dimension_semantics=("parallel", "arbitrary"),
            vmem_limit_bytes=32 * 1024 * 1024),
    )(fx, fh, rhs, fbt, sqrtw_row)

    count = jnp.float32(n_true * n_bins)
    l1 = jnp.sum(sabs) / count
    l2 = jnp.sqrt(jnp.sum(ssq) / count)
    return l1 + l2


# ----------------------------------------------------------------------------
# Pure-JAX f32 reference (same math, unpadded, no Pallas) for a sanity check
# ----------------------------------------------------------------------------
def stft_loss_ref(x, x_hat, cos_mat, sin_mat, fbT, mask_row, fft_size, hop_size):
    def mel(sig):
        fr = frame_signal(sig.reshape(-1, sig.shape[-1]), fft_size, hop_size)
        re = fr @ cos_mat
        im = fr @ sin_mat
        mag = jnp.sqrt(jnp.maximum(re * re + im * im, EPS))
        return mag @ fbT
    d = mel(x) - mel(x_hat)
    l1 = jnp.mean(jnp.abs(d) * mask_row)
    l2 = jnp.sqrt(jnp.mean(d * d * mask_row))
    return l1 + l2


if __name__ == "__main__":
    # Module config (small, consistent with STFTLoss.__init__ constraints).
    fft_size = 128
    hop_size = 32
    win_length = 128
    sample_rate = 16000
    n_bins = 32
    freq_weights_p = 0.0
    freq_weights_warmup_epochs = 10

    # Deterministic parameters (synthetic, no checkpoint load).
    cos_np, sin_np = dft_matrices(fft_size, win_length)        # (F, K)
    fb_np = mel_filterbank(sample_rate, fft_size, n_bins)      # (n_bins, K)
    mask_np = compute_mask(n_bins, freq_weights_p,
                           freq_weights_warmup_epochs, 0)      # (n_bins, 1)

    rhs, fbt, sqrtw_row = pad_constants(cos_np, sin_np, fb_np, mask_np,
                                        fft_size, n_bins)

    # Inputs: (B, C, T) waveforms, flattened to (-1, T) inside forward.
    key = jax.random.PRNGKey(0)
    k1, k2 = jax.random.split(key)
    x = jax.random.normal(k1, (2, 1, 512), dtype=jnp.float32)
    x_hat = jax.random.normal(k2, (2, 1, 512), dtype=jnp.float32)

    loss = stft_loss_pallas(x, x_hat, rhs, fbt, sqrtw_row, n_bins,
                            fft_size, hop_size)
    loss = jax.block_until_ready(loss)

    ref = jax.block_until_ready(
        stft_loss_ref(x, x_hat, jnp.asarray(cos_np), jnp.asarray(sin_np),
                      jnp.asarray(fb_np.T), jnp.asarray(mask_np.T),
                      fft_size, hop_size))
    np.testing.assert_allclose(np.asarray(loss), np.asarray(ref),
                               rtol=5e-2, atol=1e-3)

    print("KERNEL_OK")
</pallas_src>

<mosaic_0001>
module attributes {stable_mosaic.version = 11 : i64} {
  func.func @stft_loss_kernel(%arg0: i32, %arg1: i32, %arg2: memref<40x128xbf16, #tpu.memory_space<vmem>>, %arg3: memref<40x128xbf16, #tpu.memory_space<vmem>>, %arg4: memref<128x256xbf16, #tpu.memory_space<vmem>>, %arg5: memref<128x128xbf16, #tpu.memory_space<vmem>>, %arg6: memref<1x128xf32, #tpu.memory_space<vmem>>, %arg7: memref<1x8x128xf32, #tpu.memory_space<vmem>>, %arg8: memref<1x8x128xf32, #tpu.memory_space<vmem>>) attributes {dimension_semantics = [#tpu.dimension_semantics<parallel>, #tpu.dimension_semantics<arbitrary>], iteration_bounds = array<i64: 1, 1>, scalar_prefetch = 0 : i64, scratch_operands = 0 : i64, tpu.core_type = #tpu.core_type<tc>, window_params = [{transform_indices = @transform_0, window_bounds = array<i64: 40, 128>}, {transform_indices = @transform_1, window_bounds = array<i64: 40, 128>}, {pipeline_mode = #tpu.pipeline_mode<synchronous>, transform_indices = @transform_2, window_bounds = array<i64: 128, 256>}, {pipeline_mode = #tpu.pipeline_mode<synchronous>, transform_indices = @transform_3, window_bounds = array<i64: 128, 128>}, {pipeline_mode = #tpu.pipeline_mode<synchronous>, transform_indices = @transform_4, window_bounds = array<i64: 1, 128>}, {transform_indices = @transform_5, window_bounds = array<i64: 1, 8, 128>}, {transform_indices = @transform_6, window_bounds = array<i64: 1, 8, 128>}]} {
    %c0_i32 = arith.constant 0 : i32
    %0 = arith.cmpi eq, %arg1, %c0_i32 : i32
    %1 = arith.extui %0 : i1 to i32
    %c0_i32_0 = arith.constant 0 : i32
    %2 = arith.cmpi ne, %1, %c0_i32_0 : i32
    scf.if %2 {
      %cst_30 = arith.constant 0.000000e+00 : f32
      %46 = vector.broadcast %cst_30 : f32 to vector<1x8x128xf32>
      %c0_31 = arith.constant 0 : index
      %c0_32 = arith.constant 0 : index
      %c0_33 = arith.constant 0 : index
      %47 = vector.load %arg7[%c0_31, %c0_32, %c0_33] : memref<1x8x128xf32, #tpu.memory_space<vmem>>, vector<1x8x128xf32>
      tpu.vector_store %arg7[%c0_31, %c0_32, %c0_33], %46 {strides = array<i32>} : memref<1x8x128xf32, #tpu.memory_space<vmem>>, vector<1x8x128xf32>,
      %cst_34 = arith.constant 0.000000e+00 : f32
      %48 = vector.broadcast %cst_34 : f32 to vector<1x8x128xf32>
      %c0_35 = arith.constant 0 : index
      %c0_36 = arith.constant 0 : index
      %c0_37 = arith.constant 0 : index
      %49 = vector.load %arg8[%c0_35, %c0_36, %c0_37] : memref<1x8x128xf32, #tpu.memory_space<vmem>>, vector<1x8x128xf32>
      tpu.vector_store %arg8[%c0_35, %c0_36, %c0_37], %48 {strides = array<i32>} : memref<1x8x128xf32, #tpu.memory_space<vmem>>, vector<1x8x128xf32>,
    } else {
    }
    %c0 = arith.constant 0 : index
    %c0_1 = arith.constant 0 : index
    %3 = vector.load %arg2[%c0, %c0_1] : memref<40x128xbf16, #tpu.memory_space<vmem>>, vector<40x128xbf16>
    %c0_2 = arith.constant 0 : index
    %c0_3 = arith.constant 0 : index
    %4 = vector.load %arg4[%c0_2, %c0_3] : memref<128x256xbf16, #tpu.memory_space<vmem>>, vector<128x256xbf16>
    %cst = arith.constant dense<0.000000e+00> : vector<40x256xf32>
    %5 = tpu.matmul %3, %4, %cst {dimension_numbers = #tpu.dot_dimension_numbers<[1], [0], [0], [1], [0, 0, 1, 1], [], []>} : vector<40x128xbf16>, vector<128x256xbf16>, vector<40x256xf32> -> vector<40x256xf32>
    %c0_4 = arith.constant 0 : index
    %c0_5 = arith.constant 0 : index
    %6 = vector.load %arg3[%c0_4, %c0_5] : memref<40x128xbf16, #tpu.memory_space<vmem>>, vector<40x128xbf16>
    %c0_6 = arith.constant 0 : index
    %c0_7 = arith.constant 0 : index
    %7 = vector.load %arg4[%c0_6, %c0_7] : memref<128x256xbf16, #tpu.memory_space<vmem>>, vector<128x256xbf16>
    %cst_8 = arith.constant dense<0.000000e+00> : vector<40x256xf32>
    %8 = tpu.matmul %6, %7, %cst_8 {dimension_numbers = #tpu.dot_dimension_numbers<[1], [0], [0], [1], [0, 0, 1, 1], [], []>} : vector<40x128xbf16>, vector<128x256xbf16>, vector<40x256xf32> -> vector<40x256xf32>
    %9 = vector.extract_strided_slice %5 {offsets = [0, 0], sizes = [40, 128], strides = [1, 1]} : vector<40x256xf32> to vector<40x128xf32>
    %10 = vector.extract_strided_slice %5 {offsets = [0, 128], sizes = [40, 128], strides = [1, 1]} : vector<40x256xf32> to vector<40x128xf32>
    %11 = vector.extract_strided_slice %8 {offsets = [0, 0], sizes = [40, 128], strides = [1, 1]} : vector<40x256xf32> to vector<40x128xf32>
    %12 = vector.extract_strided_slice %8 {offsets = [0, 128], sizes = [40, 128], strides = [1, 1]} : vector<40x256xf32> to vector<40x128xf32>
    %13 = arith.mulf %9, %9 : vector<40x128xf32>
    %14 = arith.mulf %10, %10 : vector<40x128xf32>
    %15 = arith.addf %13, %14 : vector<40x128xf32>
    %cst_9 = arith.constant 9.99999993E-9 : f32
    %16 = vector.broadcast %cst_9 : f32 to vector<40x128xf32>
    %17 = arith.maximumf %15, %16 : vector<40x128xf32>
    %18 = math.sqrt %17 : vector<40x128xf32>
    %19 = arith.mulf %11, %11 : vector<40x128xf32>
    %20 = arith.mulf %12, %12 : vector<40x128xf32>
    %21 = arith.addf %19, %20 : vector<40x128xf32>
    %cst_10 = arith.constant 9.99999993E-9 : f32
    %22 = vector.broadcast %cst_10 : f32 to vector<40x128xf32>
    %23 = arith.maximumf %21, %22 : vector<40x128xf32>
    %24 = math.sqrt %23 : vector<40x128xf32>
    %25 = arith.subf %18, %24 : vector<40x128xf32>
    %26 = arith.truncf %25 : vector<40x128xf32> to vector<40x128xbf16>
    %c0_11 = arith.constant 0 : index
    %c0_12 = arith.constant 0 : index
    %27 = vector.load %arg5[%c0_11, %c0_12] : memref<128x128xbf16, #tpu.memory_space<vmem>>, vector<128x128xbf16>
    %cst_13 = arith.constant dense<0.000000e+00> : vector<40x128xf32>
    %28 = tpu.matmul %26, %27, %cst_13 {dimension_numbers = #tpu.dot_dimension_numbers<[1], [0], [0], [1], [0, 0, 1, 1], [], []>} : vector<40x128xbf16>, vector<128x128xbf16>, vector<40x128xf32> -> vector<40x128xf32>
    %29 = math.absf %28 : vector<40x128xf32>
    %c0_14 = arith.constant 0 : index
    %c0_15 = arith.constant 0 : index
    %30 = vector.load %arg6[%c0_14, %c0_15] : memref<1x128xf32, #tpu.memory_space<vmem>>, vector<1x128xf32>
    %31 = vector.broadcast %30 : vector<1x128xf32> to vector<40x128xf32>
    %32 = arith.mulf %29, %31 : vector<40x128xf32>
    %33 = arith.mulf %28, %28 : vector<40x128xf32>
    %c0_16 = arith.constant 0 : index
    %c0_17 = arith.constant 0 : index
    %c0_18 = arith.constant 0 : index
    %34 = vector.load %arg7[%c0_16, %c0_17, %c0_18] : memref<1x8x128xf32, #tpu.memory_space<vmem>>, vector<1x8x128xf32>
    %35 = vector.shape_cast %32 : vector<40x128xf32> to vector<5x8x128xf32>
    %cst_19 = arith.constant dense<0.000000e+00> : vector<8x128xf32>
    %36 = vector.multi_reduction <add>, %35, %cst_19 [0] : vector<5x8x128xf32> to vector<8x128xf32>
    %37 = vector.shape_cast %36 : vector<8x128xf32> to vector<1x8x128xf32>
    %38 = arith.addf %34, %37 : vector<1x8x128xf32>
    %c0_20 = arith.constant 0 : index
    %c0_21 = arith.constant 0 : index
    %c0_22 = arith.constant 0 : index
    %39 = vector.load %arg7[%c0_20, %c0_21, %c0_22] : memref<1x8x128xf32, #tpu.memory_space<vmem>>, vector<1x8x128xf32>
    tpu.vector_store %arg7[%c0_20, %c0_21, %c0_22], %38 {strides = array<i32>} : memref<1x8x128xf32, #tpu.memory_space<vmem>>, vector<1x8x128xf32>,
    %c0_23 = arith.constant 0 : index
    %c0_24 = arith.constant 0 : index
    %c0_25 = arith.constant 0 : index
    %40 = vector.load %arg8[%c0_23, %c0_24, %c0_25] : memref<1x8x128xf32, #tpu.memory_space<vmem>>, vector<1x8x128xf32>
    %41 = vector.shape_cast %33 : vector<40x128xf32> to vector<5x8x128xf32>
    %cst_26 = arith.constant dense<0.000000e+00> : vector<8x128xf32>
    %42 = vector.multi_reduction <add>, %41, %cst_26 [0] : vector<5x8x128xf32> to vector<8x128xf32>
    %43 = vector.shape_cast %42 : vector<8x128xf32> to vector<1x8x128xf32>
    %44 = arith.addf %40, %43 : vector<1x8x128xf32>
    %c0_27 = arith.constant 0 : index
    %c0_28 = arith.constant 0 : index
    %c0_29 = arith.constant 0 : index
    %45 = vector.load %arg8[%c0_27, %c0_28, %c0_29] : memref<1x8x128xf32, #tpu.memory_space<vmem>>, vector<1x8x128xf32>
    tpu.vector_store %arg8[%c0_27, %c0_28, %c0_29], %44 {strides = array<i32>} : memref<1x8x128xf32, #tpu.memory_space<vmem>>, vector<1x8x128xf32>,
    return
  }
  func.func @transform_0(%arg0: i32, %arg1: i32) -> (i32, i32) {
    %c1_i32 = arith.constant 1 : i32
    %0 = arith.muli %arg0, %c1_i32 : i32
    %1 = arith.addi %0, %arg1 : i32
    %c0_i32 = arith.constant 0 : i32
    %c0_i32_0 = arith.constant 0 : i32
    return %1, %c0_i32 : i32, i32
  }
  func.func @transform_1(%arg0: i32, %arg1: i32) -> (i32, i32) {
    %c1_i32 = arith.constant 1 : i32
    %0 = arith.muli %arg0, %c1_i32 : i32
    %1 = arith.addi %0, %arg1 : i32
    %c0_i32 = arith.constant 0 : i32
    %c0_i32_0 = arith.constant 0 : i32
    return %1, %c0_i32 : i32, i32
  }
  func.func @transform_2(%arg0: i32, %arg1: i32) -> (i32, i32) {
    %c0_i32 = arith.constant 0 : i32
    %c0_i32_0 = arith.constant 0 : i32
    %c0_i32_1 = arith.constant 0 : i32
    return %c0_i32, %c0_i32_0 : i32, i32
  }
  func.func @transform_3(%arg0: i32, %arg1: i32) -> (i32, i32) {
    %c0_i32 = arith.constant 0 : i32
    %c0_i32_0 = arith.constant 0 : i32
    %c0_i32_1 = arith.constant 0 : i32
    return %c0_i32, %c0_i32_0 : i32, i32
  }
  func.func @transform_4(%arg0: i32, %arg1: i32) -> (i32, i32) {
    %c0_i32 = arith.constant 0 : i32
    %c0_i32_0 = arith.constant 0 : i32
    %c0_i32_1 = arith.constant 0 : i32
    return %c0_i32, %c0_i32_0 : i32, i32
  }
  func.func @transform_5(%arg0: i32, %arg1: i32) -> (i32, i32, i32) {
    %c0_i32 = arith.constant 0 : i32
    %c0_i32_0 = arith.constant 0 : i32
    %c0_i32_1 = arith.constant 0 : i32
    return %arg0, %c0_i32, %c0_i32_0 : i32, i32, i32
  }
  func.func @transform_6(%arg0: i32, %arg1: i32) -> (i32, i32, i32) {
    %c0_i32 = arith.constant 0 : i32
    %c0_i32_0 = arith.constant 0 : i32
    %c0_i32_1 = arith.constant 0 : i32
    return %arg0, %c0_i32, %c0_i32_0 : i32, i32, i32
  }
}

</mosaic_0001>

<bundles_post_ra>
// kernel: tpu_custom_call.1
= control target key start
LH: loop header
LB: loop body
LE: loop exit
PB: predicated region body
PF: predicated region fallthrough
CT: control target
= control target key end

     0   :  { %12 = vsyncpa [#allocation3], 0  ;;  %s1217_s0 = inlined_call_operand.hbm [shape: bf16[40,128], index: 0, kind: input, shape index: {}]   ;;  %s1218_s1 = inlined_call_operand.hbm [shape: bf16[40,128], index: 1, kind: input, shape index: {}]   ;;  %s1219_s2 = inlined_call_operand.hbm [shape: bf16[128,256], index: 2, kind: input, shape index: {}]   ;;  %s1220_s3 = inlined_call_operand.hbm [shape: bf16[128,128], index: 3, kind: input, shape index: {}]   ;;  %s1221_s4 = inlined_call_operand.vmem [shape: f32[1,128], index: 4, kind: input, shape index: {}]   ;;  %s1222_s5 = inlined_call_operand.hbm [shape: f32[1,8,128], index: 5, kind: output, shape index: {0}]   ;;  %s1223_s6 = inlined_call_operand.hbm [shape: f32[1,8,128], index: 6, kind: output, shape index: {1}]  }
   0x1   :  { %13 = vsyncpa [#allocation6], 0 }
   0x2   :  { %14 = vsyncpa [#allocation9], 0 }
   0x3   :  { %15 = vsyncpa [#allocation4], 0 }
   0x4   :  { %16 = vsyncpa [#allocation12], 0  ;;  %s962_s21 = smov [#allocation5]   ;;  %s963_s23 = smov [#allocation2]  }
   0x5   :  { %s42_s22 = sshll.u32 %s962_s21, 4  ;;  %s26_s24 = sshll.u32 %s963_s23, 4  ;;  %s43_s22 = int_to_ptr.vmem [resolvable:$true] %s42_s22  ;;  %s1010_s24 = int_to_ptr.vmem [resolvable:$true] %s26_s24 }
   0x6   :  { %s820_s27 = scalar_lea.hbm %s1218_s1, 320 }
   0x7   :  { %p821_p0 = scmp.ne.s32.totalorder %s1218_s1, %s820_s27  ;;  %p824_p1 = scmp.lt.u32.totalorder %s820_s27, %s1218_s1 }
   0x9   :  { %p826_p2 = pnand %p824_p1, %p821_p0 }
   0xb   :  { %829 = shalt.err (!%p826_p2)
}
   0xc   :  { %s830_s8 = scalar_lea.vmem %s43_s22, 320  ;;  %p835_p4 = scmp.lt.s32.totalorder %s43_s22, %s43_s22 }
   0xd   :  { %p831_p3 = scmp.ne.s32.totalorder %s43_s22, %s830_s8  ;;  %p836_p5 = scmp.lt.s32.totalorder %s830_s8, %s830_s8 }
   0xf   :  { %p837_p6 = por %p836_p5, %p835_p4 }
  0x11   :  { %p838_p7 = pnand %p837_p6, %p831_p3 }
  0x13   :  { %841 = shalt.err (!%p838_p7)
}
  0x14   :  { %s964_s9 = smov 64   ;;  %s965_s10 = smov 4  }
  0x15   :  { %48 = dma.hbm_to_vmem [thread:$0]  %s1218_s1, 320, %s43_s22, [#allocation6], %s964_s9, %s964_s9, %s965_s10  }
  0x16   :  { %s842_s15 = scalar_lea.hbm %s1217_s0, 320 }
  0x17   :  { %p843_p8 = scmp.ne.s32.totalorder %s1217_s0, %s842_s15  ;;  %p846_p9 = scmp.lt.u32.totalorder %s842_s15, %s1217_s0 }
  0x19   :  { %p848_p10 = pnand %p846_p9, %p843_p8 }
  0x1b   :  { %851 = shalt.err (!%p848_p10)
}
  0x1c   :  { %s852_s20 = scalar_lea.vmem %s1010_s24, 320  ;;  %p857_p12 = scmp.lt.s32.totalorder %s1010_s24, %s1010_s24 }
  0x1d   :  { %p853_p11 = scmp.ne.s32.totalorder %s1010_s24, %s852_s20  ;;  %p858_p13 = scmp.lt.s32.totalorder %s852_s20, %s852_s20 }
  0x1f   :  { %p859_p0 = por %p858_p13, %p857_p12 }
  0x21   :  { %p860_p1 = pnand %p859_p0, %p853_p11 }
  0x23   :  { %863 = shalt.err (!%p860_p1)
}
  0x24   :  { %32 = dma.hbm_to_vmem [thread:$0]  %s1217_s0, 320, %s1010_s24, [#allocation3], %s964_s9, %s964_s9, %s965_s10  }
  0x25   :  { %s966_s22 = smov [#allocation7]   ;;  %s864_s27 = scalar_lea.hbm %s1219_s2, 2048 }
  0x26   :  { %s54_s23 = sshll.u32 %s966_s22, 4  ;;  %p865_p2 = scmp.ne.s32.totalorder %s1219_s2, %s864_s27  ;;  %s55_s23 = int_to_ptr.vmem [resolvable:$true] %s54_s23 }
  0x27   :  { %p868_p3 = scmp.lt.u32.totalorder %s864_s27, %s1219_s2 }
  0x29   :  { %p870_p4 = pnand %p868_p3, %p865_p2 }
  0x2b   :  { %873 = shalt.err (!%p870_p4)
}
  0x2c   :  { %s874_s8 = scalar_lea.vmem %s55_s23, 2048  ;;  %p879_p6 = scmp.lt.s32.totalorder %s55_s23, %s55_s23 }
  0x2d   :  { %p875_p5 = scmp.ne.s32.totalorder %s55_s23, %s874_s8  ;;  %p880_p7 = scmp.lt.s32.totalorder %s874_s8, %s874_s8 }
  0x2f   :  { %p881_p8 = por %p880_p7, %p879_p6 }
  0x31   :  { %p882_p9 = pnand %p881_p8, %p875_p5 }
  0x33   :  { %885 = shalt.err (!%p882_p9)
}
  0x34   :  { %s967_s0 = smov 128   ;;  %s968_s24 = smov 8  }
  0x35   :  { %60 = dma.hbm_to_vmem [thread:$0]  %s1219_s2, 2048, %s55_s23, [#allocation6], %s967_s0, %s967_s0, %s968_s24  }
  0x36   :  { %s969_s13 = smov [#allocation8]   ;;  %s886_s17 = scalar_lea.hbm %s1220_s3, 1024 }
  0x37   :  { %s66_s14 = sshll.u32 %s969_s13, 4  ;;  %p887_p10 = scmp.ne.s32.totalorder %s1220_s3, %s886_s17  ;;  %s67_s14 = int_to_ptr.vmem [resolvable:$true] %s66_s14 }
  0x38   :  { %p890_p11 = scmp.lt.u32.totalorder %s886_s17, %s1220_s3 }
  0x3a   :  { %p892_p12 = pnand %p890_p11, %p887_p10 }
  0x3c   :  { %895 = shalt.err (!%p892_p12)
}
  0x3d   :  { %s896_s21 = scalar_lea.vmem %s67_s14, 1024  ;;  %p901_p0 = scmp.lt.s32.totalorder %s67_s14, %s67_s14 }
  0x3e   :  { %p897_p13 = scmp.ne.s32.totalorder %s67_s14, %s896_s21  ;;  %p902_p1 = scmp.lt.s32.totalorder %s896_s21, %s896_s21 }
  0x40   :  { %p903_p2 = por %p902_p1, %p901_p0 }
  0x42   :  { %p904_p3 = pnand %p903_p2, %p897_p13 }
  0x44   :  { %907 = shalt.err (!%p904_p3)
}
  0x45   :  { %72 = dma.hbm_to_vmem [thread:$0]  %s1220_s3, 1024, %s67_s14, [#allocation9], %s964_s9, %s964_s9, %s965_s10  }
  0x46   :  { %952 = dma.done.wait [#allocation3], 320  }
  0x47   :  { %953 = vsyncadd [#allocation3], 4294966976 }
  0x48   :  { %954 = dma.done.wait [#allocation6], 2368  }
  0x49   :  { %955 = vsyncadd [#allocation6], 4294964928 }
  0x4a   :  { %956 = dma.done.wait [#allocation9], 1024  }
  0x4b   :  { %957 = vsyncadd [#allocation9], 4294966272  ;;  %v970_v0 = vmov 0   ;;  %v762_v1 = vld [vmem:[#allocation7 + $0x4] ss:$8 sps:$4 sm:$0xff]   ;;  %v786_v17 = vld [vmem:[#allocation2] sm:$0xff]  }
  0x4c   :  { %247 = vmatprep.mubr.bf16.mxu0 %v970_v0  ;;  %329 = vmatprep.mubr.bf16.mxu1 %v970_v0  ;;  %v764_v2 = vld [vmem:[#allocation7] ss:$8 sps:$4 sm:$0xff]   ;;  %v765_v3 = vld [vmem:[#allocation7 + $0x14] ss:$8 sps:$4 sm:$0xff]   ;;  %v767_v4 = vld [vmem:[#allocation7 + $0x10] ss:$8 sps:$4 sm:$0xff]  }
  0x4d   :  { %215 = vmatprep.subr.bf16.mxu0 %v762_v1  ;;  %297 = vmatprep.subr.bf16.mxu1 %v762_v1  ;;  %v768_v5 = vld [vmem:[#allocation7 + $0x24] ss:$8 sps:$4 sm:$0xff]   ;;  %v770_v6 = vld [vmem:[#allocation7 + $0x20] ss:$8 sps:$4 sm:$0xff]   ;;  %v771_v7 = vld [vmem:[#allocation7 + $0x34] ss:$8 sps:$4 sm:$0xff]  }
  0x4e   :  { %216 = vmatpush1.bf16.msra.mxu0 %v764_v2  ;;  %298 = vmatpush1.bf16.msra.mxu1 %v764_v2  ;;  %v773_v8 = vld [vmem:[#allocation7 + $0x30] ss:$8 sps:$4 sm:$0xff]   ;;  %v774_v9 = vld [vmem:[#allocation7 + $0x44] ss:$8 sps:$4 sm:$0xff]   ;;  %v776_v10 = vld [vmem:[#allocation7 + $0x40] ss:$8 sps:$4 sm:$0xff]  }
  0x4f   :  { %217 = vmatprep.subr.bf16.mxu0 %v765_v3  ;;  %299 = vmatprep.subr.bf16.mxu1 %v765_v3  ;;  %v777_v11 = vld [vmem:[#allocation7 + $0x54] ss:$8 sps:$4 sm:$0xff]   ;;  %v779_v12 = vld [vmem:[#allocation7 + $0x50] ss:$8 sps:$4 sm:$0xff]   ;;  %v780_v13 = vld [vmem:[#allocation7 + $0x64] ss:$8 sps:$4 sm:$0xff]  }
  0x50   :  { %v782_v14 = vld [vmem:[#allocation7 + $0x60] ss:$8 sps:$4 sm:$0xff]   ;;  %v783_v15 = vld [vmem:[#allocation7 + $0x74] ss:$8 sps:$4 sm:$0xff]   ;;  %v785_v16 = vld [vmem:[#allocation7 + $0x70] ss:$8 sps:$4 sm:$0xff]  }
  0x51   :  { %v787_v18 = vld [vmem:[#allocation5] sm:$0xff]   ;;  %v971_v19 = vmov 0.0   ;;  %v792_v20 = vld [vmem:[#allocation8] sm:$0xff]   ;;  %v789_v22 = vld [vmem:[#allocation5 + $0x8] sm:$0xff]   ;;  %vm972_vm0 = vmmov 0   ;;  %s974_s23 = smov [#allocation10]  }
  0x52   :  { %218 = vmatpush1.bf16.msra.mxu0 %v767_v4  ;;  %300 = vmatpush1.bf16.msra.mxu1 %v767_v4  ;;  %v788_v21 = vld [vmem:[#allocation2 + $0x8] sm:$0xff]   ;;  %v790_v23 = vld [vmem:[#allocation2 + $0x10] ss:$0 sps:$4 sm:$0xff]   ;;  %v791_v24 = vld [vmem:[#allocation5 + $0x10] ss:$0 sps:$4 sm:$0xff]   ;;  %s638_s25 = sshll.u32 %s974_s23, 4  ;;  %s639_s25 = int_to_ptr.vmem [resolvable:$true] %s638_s25 }
  0x53   :  { %219 = vmatprep.subr.bf16.mxu0 %v768_v5  ;;  %301 = vmatprep.subr.bf16.mxu1 %v768_v5  ;;  %v793_v25 = vld [vmem:[#allocation8 + $0x8] sm:$0xff]   ;;  %v794_v26 = vld [vmem:[#allocation8 + $0x10] sm:$0xff]   ;;  %v795_v27 = vld [vmem:[#allocation8 + $0x18] sm:$0xff]  }
  0x54   :  { %v796_v28 = vld [vmem:[#allocation8 + $0x20] sm:$0xff]   ;;  %v797_v29 = vld [vmem:[#allocation8 + $0x28] sm:$0xff]   ;;  %v798_v30 = vld [vmem:[#allocation8 + $0x30] sm:$0xff]  }
  0x55   :  { %v799_v31 = vld [vmem:[#allocation8 + $0x38] sm:$0xff]  }
  0x56   :  { %220 = vmatpush1.bf16.msra.mxu0 %v770_v6  ;;  %302 = vmatpush1.bf16.msra.mxu1 %v770_v6 }
  0x57   :  { %221 = vmatprep.subr.bf16.mxu0 %v771_v7  ;;  %303 = vmatprep.subr.bf16.mxu1 %v771_v7 }
  0x5a   :  { %222 = vmatpush1.bf16.msra.mxu0 %v773_v8  ;;  %304 = vmatpush1.bf16.msra.mxu1 %v773_v8 }
  0x5b   :  { %223 = vmatprep.subr.bf16.mxu0 %v774_v9  ;;  %305 = vmatprep.subr.bf16.mxu1 %v774_v9 }
  0x5e   :  { %224 = vmatpush1.bf16.msra.mxu0 %v776_v10  ;;  %306 = vmatpush1.bf16.msra.mxu1 %v776_v10 }
  0x5f   :  { %225 = vmatprep.subr.bf16.mxu0 %v777_v11  ;;  %307 = vmatprep.subr.bf16.mxu1 %v777_v11 }
  0x62   :  { %226 = vmatpush1.bf16.msra.mxu0 %v779_v12  ;;  %308 = vmatpush1.bf16.msra.mxu1 %v779_v12 }
  0x63   :  { %227 = vmatprep.subr.bf16.mxu0 %v780_v13  ;;  %309 = vmatprep.subr.bf16.mxu1 %v780_v13 }
  0x66   :  { %228 = vmatpush1.bf16.msra.mxu0 %v782_v14  ;;  %310 = vmatpush1.bf16.msra.mxu1 %v782_v14 }
  0x67   :  { %229 = vmatprep.subr.bf16.mxu0 %v783_v15  ;;  %311 = vmatprep.subr.bf16.mxu1 %v783_v15 }
  0x6a   :  { %230 = vmatpush1.bf16.msra.mxu0 %v785_v16  ;;  %312 = vmatpush1.bf16.msra.mxu1 %v785_v16 }
  0x6b   :  { %705 = vmatprep.subr.bf16.mxu0 %v971_v19  ;;  %733 = vmatprep.subr.bf16.mxu1 %v971_v19 }
  0x6d   :  { %248 = vmatmul.mubr.bf16.vlgmr.msra.gmra.mrb[0].mxu0 %v786_v17  ;;  %330 = vmatmul.mubr.bf16.vlgmr.msra.gmra.mrb[0].mxu1 %v787_v18 }
  0x6e   :  { %257 = vmatprep.mubr.bf16.mxu0 %v970_v0  ;;  %339 = vmatprep.mubr.bf16.mxu1 %v970_v0 }
  0x6f   :  { %706 = vmatpush3.bf16.msra.mxu0 %v792_v20  ;;  %741 = vmatpush3.bf16.msra.mxu1 %v792_v20 }
  0x70   :  { %707 = vmatprep.subr.bf16.mxu0 %v971_v19  ;;  %734 = vmatprep.subr.bf16.mxu1 %v971_v19 }
  0x73   :  { %708 = vmatpush3.bf16.msra.mxu0 %v793_v25  ;;  %742 = vmatpush3.bf16.msra.mxu1 %v793_v25 }
  0x74   :  { %709 = vmatprep.subr.bf16.mxu0 %v971_v19  ;;  %735 = vmatprep.subr.bf16.mxu1 %v971_v19 }
  0x75   :  { %258 = vmatmul.mubr.bf16.gmra.mrb[4].mxu0 %v788_v21  ;;  %340 = vmatmul.mubr.bf16.gmra.mrb[4].mxu1 %v789_v22 }
  0x76   :  { %267 = vmatprep.mubr.bf16.mxu0 %v970_v0  ;;  %349 = vmatprep.mubr.bf16.mxu1 %v970_v0 }
  0x77   :  { %710 = vmatpush3.bf16.msra.mxu0 %v794_v26  ;;  %743 = vmatpush3.bf16.msra.mxu1 %v794_v26 }
  0x78   :  { %711 = vmatprep.subr.bf16.mxu0 %v971_v19  ;;  %736 = vmatprep.subr.bf16.mxu1 %v971_v19 }
  0x7b   :  { %712 = vmatpush3.bf16.msra.mxu0 %v795_v27  ;;  %744 = vmatpush3.bf16.msra.mxu1 %v795_v27 }
  0x7c   :  { %713 = vmatprep.subr.bf16.mxu0 %v971_v19  ;;  %737 = vmatprep.subr.bf16.mxu1 %v971_v19 }
  0x7d   :  { %268 = vmatmul.mubr.bf16.gmra.mrb[8].mxu0 %v790_v23  ;;  %350 = vmatmul.mubr.bf16.gmra.mrb[8].mxu1 %v791_v24 }
  0x7e   :  { %721 = vmatprep.mubr.msk.bf16.mxu0 %vm972_vm0, %v971_v19  ;;  %725 = vmatprep.mubr.msk.bf16.mxu1 %vm972_vm0, %v971_v19 }
  0x7f   :  { %714 = vmatpush3.bf16.msra.mxu0 %v796_v28  ;;  %745 = vmatpush3.bf16.msra.mxu1 %v796_v28 }
  0x80   :  { %715 = vmatprep.subr.bf16.mxu0 %v971_v19  ;;  %738 = vmatprep.subr.bf16.mxu1 %v971_v19 }
  0x83   :  { %716 = vmatpush3.bf16.msra.mxu0 %v797_v29  ;;  %746 = vmatpush3.bf16.msra.mxu1 %v797_v29 }
  0x84   :  { %717 = vmatprep.subr.bf16.mxu0 %v971_v19  ;;  %739 = vmatprep.subr.bf16.mxu1 %v971_v19 }
  0x87   :  { %718 = vmatpush3.bf16.msra.mxu0 %v798_v30  ;;  %747 = vmatpush3.bf16.msra.mxu1 %v798_v30 }
  0x88   :  { %719 = vmatprep.subr.bf16.mxu0 %v971_v19  ;;  %740 = vmatprep.subr.bf16.mxu1 %v971_v19 }
  0x8b   :  { %720 = vmatpush3.bf16.msra.mxu0 %v799_v31  ;;  %748 = vmatpush3.bf16.msra.mxu1 %v799_v31 }
 0x140   :  { %v249_v32 = vpop.f32.mrb[0].mxu0  ;;  %v331_v33 = vpop.f32.mrb[0].mxu1 }
 0x141   :  { %v358_v34 = vmul.f32 %v249_v32, %v249_v32  ;;  %v413_v35 = vmul.f32 %v331_v33, %v331_v33  ;;  %v251_v36 = vpop.f32.mrb[1].mxu0  ;;  %v333_v37 = vpop.f32.mrb[1].mxu1 }
 0x142   :  { %v363_v38 = vmul.f32 %v251_v36, %v251_v36  ;;  %v418_v39 = vmul.f32 %v333_v37, %v333_v37  ;;  %v253_v40 = vpop.f32.mrb[2].mxu0  ;;  %v335_v41 = vpop.f32.mrb[2].mxu1 }
 0x143   :  { %v359_v42 = vmul.f32 %v253_v40, %v253_v40  ;;  %v414_v43 = vmul.f32 %v335_v41, %v335_v41  ;;  %v255_v44 = vpop.f32.mrb[3].mxu0  ;;  %v337_v45 = vpop.f32.mrb[3].mxu1 }
 0x144   :  { %v368_v46 = vadd.f32 %v363_v38, %v358_v34  ;;  %v423_v47 = vadd.f32 %v418_v39, %v413_v35  ;;  %v364_v48 = vmul.f32 %v255_v44, %v255_v44  ;;  %v419_v49 = vmul.f32 %v337_v45, %v337_v45 }
 0x146   :  { %v1100_v50 = vmax.f32 %v368_v46, 1e-08  ;;  %v1102_v51 = vmax.f32 %v423_v47, 1e-08  ;;  %v369_v52 = vadd.f32 %v364_v48, %v359_v42  ;;  %v424_v53 = vadd.f32 %v419_v49, %v414_v43 }
 0x148   :  { %800 = vrsqrt.f32 %v1100_v50  ;;  %v1105_v54 = vmax.f32 %v369_v52, 1e-08  ;;  %v1107_v55 = vmax.f32 %v424_v53, 1e-08  ;;  %v259_v56 = vpop.f32.mrb[4].mxu0  ;;  %v341_v57 = vpop.f32.mrb[4].mxu1 }
 0x149   :  { %802 = vrsqrt.f32 %v1102_v51  ;;  %v360_v58 = vmul.f32 %v259_v56, %v259_v56  ;;  %v415_v59 = vmul.f32 %v341_v57, %v341_v57  ;;  %v261_v60 = vpop.f32.mrb[5].mxu0  ;;  %v343_v61 = vpop.f32.mrb[5].mxu1  ;;  %vm380_vm1 = vcmp.eq.f32.partialorder %v1100_v50, inf }
 0x14a   :  { %804 = vrsqrt.f32 %v1105_v54  ;;  %v365_v62 = vmul.f32 %v261_v60, %v261_v60  ;;  %v420_v63 = vmul.f32 %v343_v61, %v343_v61  ;;  %v263_v0 = vpop.f32.mrb[6].mxu0  ;;  %v345_v1 = vpop.f32.mrb[6].mxu1  ;;  %vm382_vm2 = vcmp.eq.f32.partialorder %v1100_v50, 0.0 }
 0x14b   :  { %806 = vrsqrt.f32 %v1107_v55  ;;  %v361_v2 = vmul.f32 %v263_v0, %v263_v0  ;;  %v416_v3 = vmul.f32 %v345_v1, %v345_v1  ;;  %v265_v4 = vpop.f32.mrb[7].mxu0  ;;  %v347_v5 = vpop.f32.mrb[7].mxu1  ;;  %v383_v14 = vand.u32 2147483648, %v1100_v50 }
 0x14c   :  { %v370_v6 = vadd.f32 %v365_v62, %v360_v58  ;;  %v425_v7 = vadd.f32 %v420_v63, %v415_v59  ;;  %v366_v8 = vmul.f32 %v265_v4, %v265_v4  ;;  %v421_v9 = vmul.f32 %v347_v5, %v347_v5 }
 0x14d   :  { %vm387_vm3 = vcmp.eq.f32.partialorder %v1105_v54, inf  ;;  %vm389_vm4 = vcmp.eq.f32.partialorder %v1105_v54, 0.0  ;;  %v390_v33 = vand.u32 2147483648, %v1105_v54  ;;  %vm435_vm5 = vcmp.eq.f32.partialorder %v1102_v51, inf }
 0x14e   :  { %v1112_v10 = vmax.f32 %v370_v6, 1e-08  ;;  %v1114_v11 = vmax.f32 %v425_v7, 1e-08  ;;  %v371_v12 = vadd.f32 %v366_v8, %v361_v2  ;;  %v426_v13 = vadd.f32 %v421_v9, %v416_v3 }
 0x14f   :  { %vm437_vm6 = vcmp.eq.f32.partialorder %v1102_v51, 0.0  ;;  %v438_v41 = vand.u32 2147483648, %v1102_v51  ;;  %vm442_vm7 = vcmp.eq.f32.partialorder %v1107_v55, inf  ;;  %vm444_vm8 = vcmp.eq.f32.partialorder %v1107_v55, 0.0 }
 0x150   :  { %808 = vrsqrt.f32 %v1112_v10  ;;  %v1120_v15 = vmax.f32 %v371_v12, 1e-08  ;;  %v1122_v16 = vmax.f32 %v426_v13, 1e-08  ;;  %v269_v17 = vpop.f32.mrb[8].mxu0  ;;  %v351_v18 = vpop.f32.mrb[8].mxu1 }
 0x151   :  { %810 = vrsqrt.f32 %v1114_v11  ;;  %v362_v20 = vmul.f32 %v269_v17, %v269_v17  ;;  %v417_v21 = vmul.f32 %v351_v18, %v351_v18  ;;  %v271_v22 = vpop.f32.mrb[9].mxu0  ;;  %v353_v23 = vpop.f32.mrb[9].mxu1  ;;  %v445_v48 = vand.u32 2147483648, %v1107_v55 }
 0x152   :  { %v801_v24 = vpop.eup %800  ;;  %812 = vrsqrt.f32 %v1120_v15  ;;  %v367_v25 = vmul.f32 %v271_v22, %v271_v22  ;;  %v422_v26 = vmul.f32 %v353_v23, %v353_v23  ;;  %v273_v27 = vpop.f32.mrb[10].mxu0  ;;  %vm394_vm9 = vcmp.eq.f32.partialorder %v1112_v10, inf }
 0x153   :  { %v355_v28 = vpop.f32.mrb[10].mxu1  ;;  %v803_v29 = vpop.eup %802  ;;  %v379_v30 = vmul.f32 %v801_v24, %v1100_v50  ;;  %814 = vrsqrt.f32 %v1122_v16  ;;  %vm396_vm10 = vcmp.eq.f32.partialorder %v1112_v10, 0.0  ;;  %vm401_vm11 = vcmp.eq.f32.partialorder %v1120_v15, inf }
 0x154   :  { %v274_v31 = vpop.f32.mrb[11].mxu0  ;;  %v356_v32 = vpop.f32.mrb[11].mxu1  ;;  %v434_v35 = vmul.f32 %v803_v29, %v1102_v51  ;;  %v372_v36 = vadd.f32 %v367_v25, %v362_v20  ;;  %v427_v37 = vadd.f32 %v422_v26, %v417_v21  ;;  %vm403_vm12 = vcmp.eq.f32.partialorder %v1120_v15, 0.0 }
 0x155   :  { %v805_v34 = vpop.eup %804  ;;  %v381_v40 = vsel %vm380_vm1, %v1100_v50, %v379_v30  ;;  %v404_v62 = vand.u32 2147483648, %v1120_v15  ;;  %vm449_vm13 = vcmp.eq.f32.partialorder %v1114_v11, inf  ;;  %v452_v2 = vand.u32 2147483648, %v1114_v11  ;;  %v693_v31 = vld [vmem:[%s1221_s4] ss:$0 sm:$0xff]  ;;  %s973_s4 = smov [#allocation11]  }
 0x156   :  { %v807_v38 = vpop.eup %806  ;;  %v386_v39 = vmul.f32 %v805_v34, %v1105_v54  ;;  %v377_v43 = vmax.f32 %v372_v36, 1e-08  ;;  %v1141_v44 = vmax.f32 %v427_v37, 1e-08  ;;  %v384_v45 = vsel %vm382_vm2, %v383_v14, %v381_v40  ;;  %s648_s10 = sshll.u32 %s973_s4, 4  ;;  %s649_s10 = int_to_ptr.vmem [resolvable:$true] %s648_s10 }
 0x157   :  { %v441_v42 = vmul.f32 %v807_v38, %v1107_v55  ;;  %v436_v47 = vsel %vm435_vm5, %v1102_v51, %v434_v35  ;;  %vm451_vm14 = vcmp.eq.f32.partialorder %v1114_v11, 0.0  ;;  %vm456_vm15 = vcmp.eq.f32.partialorder %v1122_v16, inf  ;;  %s908_s26 = scalar_lea.vmem %s649_s10, 128  ;;  %p913_p5 = scmp.lt.s32.totalorder %s649_s10, %s649_s10 }
 0x158   :  { %v388_v46 = vsel %vm387_vm3, %v1105_v54, %v386_v39  ;;  %816 = vrsqrt.f32 %v377_v43  ;;  %v439_v50 = vsel %vm437_vm6, %v438_v41, %v436_v47  ;;  %v397_v54 = vand.u32 2147483648, %v1112_v10  ;;  %p909_p4 = scmp.ne.s32.totalorder %s649_s10, %s908_s26  ;;  %p914_p6 = scmp.lt.s32.totalorder %s908_s26, %s908_s26 }
 0x159   :  { %v391_v49 = vsel %vm389_vm4, %v390_v33, %v388_v46  ;;  %v443_v52 = vsel %vm442_vm7, %v1107_v55, %v441_v42  ;;  %818 = vrsqrt.f32 %v1141_v44  ;;  %v468_v56 = vsub.f32 %v384_v45, %v439_v50 }
 0x15a   :  { %v446_v53 = vsel %vm444_vm8, %v445_v48, %v443_v52  ;;  %v809_v57 = vpop.eup %808  ;;  %v459_v8 = vand.u32 2147483648, %v1122_v16  ;;  %vm458_vm1 = vcmp.eq.f32.partialorder %v1122_v16, 0.0  ;;  %vm408_vm2 = vcmp.eq.f32.partialorder %v377_v43, inf  ;;  %p915_p7 = por %p914_p6, %p913_p5 }
 0x15b   :  { %v469_v58 = vsub.f32 %v391_v49, %v446_v53  ;;  %v811_v59 = vpop.eup %810  ;;  %v393_v60 = vmul.f32 %v809_v57, %v1112_v10  ;;  %v411_v21 = vand.u32 2147483648, %v377_v43  ;;  %vm410_vm3 = vcmp.eq.f32.partialorder %v377_v43, 0.0 }
 0x15c   :  { %v813_v51 = vpop.eup %812  ;;  %v448_v55 = vmul.f32 %v811_v59, %v1114_v11  ;;  %vm463_vm4 = vcmp.eq.f32.partialorder %v1141_v44, inf  ;;  %vm465_vm5 = vcmp.eq.f32.partialorder %v1141_v44, 0.0  ;;  %p916_p8 = pnand %p915_p7, %p909_p4 }
 0x15d   :  { %v473_v61 = vpack.c.bf16 %v469_v58, %v468_v56  ;;  %v815_v63 = vpop.eup %814  ;;  %v400_v0 = vmul.f32 %v813_v51, %v1120_v15  ;;  %v395_v1 = vsel %vm394_vm9, %v1112_v10, %v393_v60 }
 0x15e   :  { %v455_v3 = vmul.f32 %v815_v63, %v1122_v16  ;;  %v398_v4 = vsel %vm396_vm10, %v397_v54, %v395_v1  ;;  %v450_v5 = vsel %vm449_vm13, %v1114_v11, %v448_v55 }
 0x15f   :  { %722 = vmatmul.mubr.bf16.vlgmr.msra.gmra.mrb[12].mxu0 %v473_v61  ;;  %v402_v6 = vsel %vm401_vm11, %v1120_v15, %v400_v0  ;;  %v453_v7 = vsel %vm451_vm14, %v452_v2, %v450_v5  ;;  %v466_v15 = vand.u32 2147483648, %v1141_v44 }
 0x160   :  { %v405_v9 = vsel %vm403_vm12, %v404_v62, %v402_v6  ;;  %v457_v10 = vsel %vm456_vm15, %v1122_v16, %v455_v3  ;;  %v470_v12 = vsub.f32 %v398_v4, %v453_v7 }
 0x161   :  { %v460_v13 = vsel %vm458_vm1, %v459_v8, %v457_v10 }
 0x162   :  { %v817_v14 = vpop.eup %816  ;;  %v471_v11 = vsub.f32 %v405_v9, %v460_v13 }
 0x163   :  { %v819_v17 = vpop.eup %818  ;;  %v407_v18 = vmul.f32 %v817_v14, %v377_v43 }
 0x164   :  { %v474_v20 = vpack.c.bf16 %v471_v11, %v470_v12  ;;  %v462_v22 = vmul.f32 %v819_v17, %v1141_v44 }
 0x165   :  { %v409_v23 = vsel %vm408_vm2, %v377_v43, %v407_v18 }
 0x166   :  { %726 = vmatmul.mubr.bf16.vlgmr.msra.gmra.mrb[12].mxu1 %v474_v20  ;;  %v412_v24 = vsel %vm410_vm3, %v411_v21, %v409_v23  ;;  %v464_v16 = vsel %vm463_vm4, %v1141_v44, %v462_v22 }
 0x167   :  { %729 = vmatprep.mubr.msk.bf16.mxu1 %vm972_vm0, %v971_v19  ;;  %v467_v25 = vsel %vm465_vm5, %v466_v15, %v464_v16 }
 0x168   :  { %v472_v26 = vsub.f32 %v412_v24, %v467_v25 }
 0x16a   :  { %v475_v27 = vpack.c.bf16 %v472_v26, %v472_v26 }
 0x16e   :  { %730 = vmatmul.mubr.bf16.gmra.mrb[16].mxu1 %v475_v27 }
 0x232   :  { %v574_v28 = vpop.f32.mrb[12].mxu0 }
 0x233   :  { %v596_v29 = vand.u32 2147483647, %v574_v28  ;;  %v723_v30 = vpop.f32.mrb[13].mxu0  ;;  %v613_v33 = vmul.f32 %v574_v28, %v574_v28 }
 0x234   :  { %v577_v32 = vpop.f32.mrb[14].mxu0 }
 0x235   :  { %v597_v34 = vand.u32 2147483647, %v577_v32  ;;  %v614_v35 = vmul.f32 %v577_v32, %v577_v32  ;;  %v724_v36 = vpop.f32.mrb[15].mxu0  ;;  %v608_v37 = vmul.f32 %v693_v31, %v596_v29 }
 0x237   :  { %v609_v38 = vmul.f32 %v693_v31, %v597_v34  ;;  %v626_v39 = vadd.f32 %v614_v35, %v613_v33 }
 0x239   :  { %v619_v19 = vadd.f32 %v609_v38, %v608_v37  ;;  %v582_v40 = vpop.f32.mrb[12].mxu1 }
 0x23a   :  { %v598_v41 = vand.u32 2147483647, %v582_v40  ;;  %v615_v42 = vmul.f32 %v582_v40, %v582_v40  ;;  %v727_v43 = vpop.f32.mrb[13].mxu1 }
 0x23b   :  { %v585_v44 = vpop.f32.mrb[14].mxu1 }
 0x23c   :  { %v610_v45 = vmul.f32 %v693_v31, %v598_v41  ;;  %v627_v46 = vadd.f32 %v626_v39, %v615_v42  ;;  %v599_v47 = vand.u32 2147483647, %v585_v44  ;;  %v616_v48 = vmul.f32 %v585_v44, %v585_v44  ;;  %v728_v49 = vpop.f32.mrb[15].mxu1 }
 0x23e   :  { %v620_v50 = vadd.f32 %v619_v19, %v610_v45  ;;  %v611_v52 = vmul.f32 %v693_v31, %v599_v47  ;;  %v628_v53 = vadd.f32 %v627_v46, %v616_v48 }
 0x240   :  { %v621_v56 = vadd.f32 %v620_v50, %v611_v52 }
 0x241   :  { %v590_v57 = vpop.f32.mrb[16].mxu1 }
 0x242   :  { %v600_v58 = vand.u32 2147483647, %v590_v57  ;;  %v617_v59 = vmul.f32 %v590_v57, %v590_v57  ;;  %v731_v60 = vpop.f32.mrb[17].mxu1 }
 0x243   :  { %v593_v54 = vpop.f32.mrb[18].mxu1 }
 0x244   :  { %v612_v51 = vmul.f32 %v693_v31, %v600_v58  ;;  %v629_v55 = vadd.f32 %v628_v53, %v617_v59  ;;  %v732_v61 = vpop.f32.mrb[19].mxu1 }
 0x246   :  { %v622_v62 = vadd.f32 %v621_v56, %v612_v51  ;;  %631 = vst [vmem:[#allocation11] sm:$0xff] %v629_v55 }
 0x247   :  { %919 = shalt.err (!%p916_p8)
}
 0x248   :  { %s920_s29 = scalar_lea.hbm %s1223_s6, 128 }
 0x249   :  { %p921_p9 = scmp.ne.s32.totalorder %s1223_s6, %s920_s29  ;;  %p924_p10 = scmp.lt.u32.totalorder %s920_s29, %s1223_s6 }
 0x24b   :  { %p926_p11 = pnand %p924_p10, %p921_p9 }
 0x24d   :  { %929 = shalt.err (!%p926_p11)
}
 0x24e   :  { %651 = dma.vmem_to_hbm [thread:$0]  %s649_s10, 128, %s1223_s6, [#allocation12]   ;;  %624 = vst [vmem:[#allocation10] sm:$0xff] %v622_v62 }
 0x24f   :  { %s930_s12 = scalar_lea.vmem %s639_s25, 128  ;;  %p935_p13 = scmp.lt.s32.totalorder %s639_s25, %s639_s25 }
 0x250   :  { %p931_p12 = scmp.ne.s32.totalorder %s639_s25, %s930_s12  ;;  %p936_p0 = scmp.lt.s32.totalorder %s930_s12, %s930_s12 }
 0x252   :  { %p937_p1 = por %p936_p0, %p935_p13 }
 0x254   :  { %p938_p2 = pnand %p937_p1, %p931_p12 }
 0x256   :  { %941 = shalt.err (!%p938_p2)
}
 0x257   :  { %s942_s15 = scalar_lea.hbm %s1222_s5, 128 }
 0x258   :  { %p943_p3 = scmp.ne.s32.totalorder %s1222_s5, %s942_s15  ;;  %p946_p4 = scmp.lt.u32.totalorder %s942_s15, %s1222_s5 }
 0x25a   :  { %p948_p5 = pnand %p946_p4, %p943_p3 }
 0x25c   :  { %951 = shalt.err (!%p948_p5)
}
 0x25d   :  { %641 = dma.vmem_to_hbm [thread:$0]  %s639_s25, 128, %s1222_s5, [#allocation4]  }
 0x25e   :  { %958 = dma.done.wait [#allocation4], 128  }
 0x25f   :  { %959 = vsyncadd [#allocation4], 4294967168 }
 0x260   :  { %960 = dma.done.wait [#allocation12], 128  }
 0x261   :  { %961 = vsyncadd [#allocation12], 4294967168 }
 0x262   :  { %658 = vsyncpa [#allocation3], 1 }
 0x263   :  { %659 = vsyncpa [#allocation6], 1 }
 0x264   :  { %660 = vsyncpa [#allocation9], 1 }
 0x265   :  { %661 = vsyncpa [#allocation4], 1 }
 0x266   :  { %662 = vsyncpa [#allocation12], 1 }

</bundles_post_ra>
